<compile_context>
chip_gen: v7x
topology: tpu7x:2x2x1
jax: 0.10.0
libtpu: 0.0.40
codegen_flags: <defaults>
</compile_context>

<pallas_src>
import math
import functools

import jax
import jax.numpy as jnp
from jax import lax
from jax.experimental import pallas as pl
from jax.experimental.pallas import tpu as pltpu


# ---------------------------------------------------------------------------
# Tiled c_attn projection:  y = x @ W^T,  W kept in PyTorch (out, in) layout
# ---------------------------------------------------------------------------

def _linear_kernel(x_ref, w_ref, o_ref, acc_ref):
    @pl.when(pl.program_id(2) == 0)
    def _():
        acc_ref[...] = jnp.zeros_like(acc_ref)

    # Contract x's K dim against w's "in" dim directly — the MXU consumes the
    # transposed-RHS contraction natively, no weight transpose is materialized.
    acc_ref[...] += lax.dot_general(
        x_ref[...], w_ref[...],
        dimension_numbers=(((1,), (1,)), ((), ())),
        preferred_element_type=jnp.float32,
    )

    @pl.when(pl.program_id(2) == pl.num_programs(2) - 1)
    def _():
        o_ref[...] = acc_ref[...].astype(o_ref.dtype)


def linear_pallas(x2d, w, *, tm=256, tn=256, tk=512):
    """x2d: (M, K), w: (N, K) [PyTorch Linear weight] -> (M, N) = x2d @ w.T."""
    M, K = x2d.shape
    N, K2 = w.shape
    assert K == K2
    tm, tn, tk = min(tm, M), min(tn, N), min(tk, K)
    assert M % tm == 0 and N % tn == 0 and K % tk == 0
    grid = (M // tm, N // tn, K // tk)
    return pl.pallas_call(
        _linear_kernel,
        out_shape=jax.ShapeDtypeStruct((M, N), x2d.dtype),
        grid_spec=pltpu.PrefetchScalarGridSpec(
            num_scalar_prefetch=0,
            grid=grid,
            in_specs=[
                pl.BlockSpec((tm, tk), lambda i, j, k: (i, k)),
                pl.BlockSpec((tn, tk), lambda i, j, k: (j, k)),
            ],
            out_specs=pl.BlockSpec((tm, tn), lambda i, j, k: (i, j)),
            scratch_shapes=[pltpu.VMEM((tm, tn), jnp.float32)],
        ),
        compiler_params=pltpu.CompilerParams(
            dimension_semantics=("parallel", "parallel", "arbitrary"),
            vmem_limit_bytes=32 * 1024 * 1024,
        ),
    )(x2d, w)


# ---------------------------------------------------------------------------
# Flash-style causal attention with GQA handled via the index_map
# ---------------------------------------------------------------------------

def _flash_attn_kernel(q_ref, k_ref, v_ref, o_ref, m_sc, l_sc, acc_sc,
                       *, scale, block_q, block_kv):
    q_idx = pl.program_id(2)
    kv_idx = pl.program_id(3)
    num_kv = pl.num_programs(3)

    @pl.when(kv_idx == 0)
    def _():
        m_sc[...] = jnp.full_like(m_sc, -jnp.inf)
        l_sc[...] = jnp.zeros_like(l_sc)
        acc_sc[...] = jnp.zeros_like(acc_sc)

    q_start = q_idx * block_q
    kv_start = kv_idx * block_kv

    # Causal skip: KV blocks entirely above the diagonal contribute nothing.
    @pl.when(kv_start <= q_start + (block_q - 1))
    def _():
        # scale folded into Q (O(Tq*hd), not O(Tq*Tkv)); operands stay in their
        # native dtype, the MXU accumulates in f32.
        q = q_ref[...] * scale
        s = lax.dot_general(
            q, k_ref[...],
            dimension_numbers=(((1,), (1,)), ((), ())),   # contract hd, K untransposed
            preferred_element_type=jnp.float32,
        )

        # Mask (cheap VPU work; only matters on diagonal-straddling blocks,
        # blocks fully below the diagonal see an all-true select).
        row = q_start + lax.broadcasted_iota(jnp.int32, (block_q, block_kv), 0)
        col = kv_start + lax.broadcasted_iota(jnp.int32, (block_q, block_kv), 1)
        s = jnp.where(col <= row, s, -jnp.inf)

        # Online softmax update (f32).
        m_prev = m_sc[...]
        m_new = jnp.maximum(m_prev, jnp.max(s, axis=-1, keepdims=True))
        alpha = jnp.exp(m_prev - m_new)
        p = jnp.exp(s - m_new)
        l_sc[...] = alpha * l_sc[...] + jnp.sum(p, axis=-1, keepdims=True)
        acc_sc[...] = alpha * acc_sc[...] + jnp.dot(
            p.astype(v_ref.dtype), v_ref[...],
            preferred_element_type=jnp.float32,
        )
        m_sc[...] = m_new

    @pl.when(kv_idx == num_kv - 1)
    def _():
        inv_l = pl.reciprocal(l_sc[...], approx=True)
        o_ref[...] = (acc_sc[...] * inv_l).astype(o_ref.dtype)


def flash_attention_gqa(q, k, v, *, n_rep, block_q=256, block_kv=512):
    """q: (B, Hq, T, hd); k, v: (B, Hkv, T, hd) with Hq = Hkv * n_rep. Causal."""
    B, Hq, T, hd = q.shape
    _, Hkv, Tk, _ = k.shape
    assert Tk == T and Hq == Hkv * n_rep
    block_q = min(block_q, T)
    block_kv = min(block_kv, T)
    assert T % block_q == 0 and T % block_kv == 0
    scale = 1.0 / math.sqrt(hd)

    grid = (B, Hq, T // block_q, T // block_kv)
    q_spec = pl.BlockSpec((None, None, block_q, hd),
                          lambda b, h, qi, ki: (b, h, qi, 0))
    kv_spec = pl.BlockSpec((None, None, block_kv, hd),
                           lambda b, h, qi, ki: (b, h // n_rep, ki, 0))
    o_spec = pl.BlockSpec((None, None, block_q, hd),
                          lambda b, h, qi, ki: (b, h, qi, 0))

    kernel = functools.partial(_flash_attn_kernel, scale=scale,
                               block_q=block_q, block_kv=block_kv)
    return pl.pallas_call(
        kernel,
        out_shape=jax.ShapeDtypeStruct((B, Hq, T, hd), q.dtype),
        grid_spec=pltpu.PrefetchScalarGridSpec(
            num_scalar_prefetch=0,
            grid=grid,
            in_specs=[q_spec, kv_spec, kv_spec],
            out_specs=o_spec,
            scratch_shapes=[
                pltpu.VMEM((block_q, 1), jnp.float32),    # running max m
                pltpu.VMEM((block_q, 1), jnp.float32),    # running denom l
                pltpu.VMEM((block_q, hd), jnp.float32),   # output accumulator
            ],
        ),
        compiler_params=pltpu.CompilerParams(
            dimension_semantics=("parallel", "parallel", "parallel", "arbitrary"),
            vmem_limit_bytes=32 * 1024 * 1024,
        ),
    )(q, k, v)


# ---------------------------------------------------------------------------
# Glue (plain JAX): rotary embedding, reshapes
# ---------------------------------------------------------------------------

def precompute_freqs(head_dim, seq_len, theta=500000.0):
    # TODO(synk): llama3.1 use_scaled_rope (apply_scaling) not implemented.
    freqs = 1.0 / (theta ** (jnp.arange(0, head_dim, 2, dtype=jnp.float32) / head_dim))
    t = jnp.arange(seq_len, dtype=jnp.float32)
    angles = jnp.outer(t, freqs)           # (T, hd//2) == angle of freqs_cis
    return jnp.cos(angles), jnp.sin(angles)


def apply_rotary_emb(xq, xk, cos, sin):
    """xq: (B, T, nh, hd), xk: (B, T, n_kv, hd); complex rotation on (even, odd) pairs."""
    # TODO(synk): fuse RoPE into the attention kernel prologue (pltpu.roll) to
    # remove this extra HBM round trip over Q/K.
    def rot(x):
        xf = x.astype(jnp.float32)
        xr = xf.reshape(*xf.shape[:-1], -1, 2)
        x_even, x_odd = xr[..., 0], xr[..., 1]
        c = cos[None, :, None, :]
        s = sin[None, :, None, :]
        out_even = x_even * c - x_odd * s
        out_odd = x_even * s + x_odd * c
        out = jnp.stack([out_even, out_odd], axis=-1).reshape(xf.shape)
        return out.astype(x.dtype)
    return rot(xq), rot(xk)


def causal_self_attention(x, w_attn, n_head, n_kv_head, cos, sin,
                          *, block_q=256, block_kv=512):
    """x: (B, T, C); w_attn: ((n_head + 2*n_kv_head)*hd, C)  [PyTorch Linear weight]."""
    B, T, C = x.shape
    hd = C // n_head
    n_rep = n_head // n_kv_head

    # qkv = x @ W^T (tiled Pallas matmul, weight kept in (out, in) layout)
    qkv = linear_pallas(x.reshape(B * T, C), w_attn)
    qkv = qkv.reshape(B, T, -1)
    q, k, v = jnp.split(
        qkv, [n_head * hd, n_head * hd + n_kv_head * hd], axis=-1
    )
    q = q.reshape(B, T, n_head, hd)
    k = k.reshape(B, T, n_kv_head, hd)
    v = v.reshape(B, T, n_kv_head, hd)

    q, k = apply_rotary_emb(q, k, cos, sin)

    # NOTE: no repeat_kv — GQA is handled in the attention kernel's index_map,
    # so each KV head is DMA'd once instead of n_rep times.
    # TODO(synk): use_kv cache path (inference cache_k/cache_v writeback) not implemented.
    q = q.transpose(0, 2, 1, 3)            # (B, nh,  T, hd)
    k = k.transpose(0, 2, 1, 3)            # (B, nkv, T, hd)
    v = v.transpose(0, 2, 1, 3)            # (B, nkv, T, hd)

    y = flash_attention_gqa(q, k, v, n_rep=n_rep,
                            block_q=block_q, block_kv=block_kv)   # (B, nh, T, hd)
    y = y.transpose(0, 2, 1, 3).reshape(B, T, C)
    return y  # NOTE: the reference forward does NOT apply c_proj.


# ---------------------------------------------------------------------------
# Pure-JAX reference (for correctness check)
# ---------------------------------------------------------------------------

def _repeat_kv_ref(x, n_rep):
    if n_rep == 1:
        return x
    return jnp.repeat(x, n_rep, axis=2)


def reference_attention(x, w_attn, n_head, n_kv_head, cos, sin):
    B, T, C = x.shape
    hd = C // n_head
    n_rep = n_head // n_kv_head
    qkv = (x.reshape(B * T, C) @ w_attn.T).reshape(B, T, -1)
    q, k, v = jnp.split(qkv, [n_head * hd, n_head * hd + n_kv_head * hd], axis=-1)
    q = q.reshape(B, T, n_head, hd)
    k = k.reshape(B, T, n_kv_head, hd)
    v = v.reshape(B, T, n_kv_head, hd)
    q, k = apply_rotary_emb(q, k, cos, sin)
    k = _repeat_kv_ref(k, n_rep)
    v = _repeat_kv_ref(v, n_rep)
    q, k, v = (a.transpose(0, 2, 1, 3) for a in (q, k, v))
    score = jnp.einsum("bhqd,bhkd->bhqk", q, k) / math.sqrt(hd)
    mask = jnp.tril(jnp.ones((T, T), dtype=bool))
    score = jnp.where(mask[None, None], score, -jnp.inf)
    att = jax.nn.softmax(score.astype(jnp.float32), axis=-1)
    y = jnp.einsum("bhqk,bhkd->bhqd", att, v)
    return y.transpose(0, 2, 1, 3).reshape(B, T, C)


# ---------------------------------------------------------------------------
# Main
# ---------------------------------------------------------------------------

if __name__ == "__main__":
    # Small config consistent with the module: n_embd=32, n_head=4, n_kv_head=2 -> hd=8.
    # T=32 with 16-wide blocks exercises the multi-block online-softmax and the
    # causal block-skip paths.
    B, T, C = 2, 32, 32
    n_head, n_kv_head = 4, 2
    hd = C // n_head
    out_dim = (n_head + 2 * n_kv_head) * hd  # 64

    key = jax.random.PRNGKey(0)
    kx, kw = jax.random.split(key)
    x = jax.random.normal(kx, (B, T, C), dtype=jnp.float32)
    w_attn = 0.02 * jax.random.normal(kw, (out_dim, C), dtype=jnp.float32)  # (out, in)

    cos, sin = precompute_freqs(hd, T)

    y = causal_self_attention(x, w_attn, n_head, n_kv_head, cos, sin,
                              block_q=16, block_kv=16)
    y = jax.block_until_ready(y)

    y_ref = reference_attention(x, w_attn, n_head, n_kv_head, cos, sin)
    assert y.shape == (B, T, C)
    # tolerance covers the approx (EUP) reciprocal in the softmax normalization
    assert jnp.allclose(y, y_ref, atol=2e-3, rtol=2e-3), "mismatch vs reference"

    print("KERNEL_OK")
</pallas_src>

<mosaic_0001>
module attributes {stable_mosaic.version = 11 : i64} {
  func.func @_linear_kernel(%arg0: i32, %arg1: i32, %arg2: i32, %arg3: memref<64x32xf32, #tpu.memory_space<vmem>>, %arg4: memref<64x32xf32, #tpu.memory_space<vmem>>, %arg5: memref<64x64xf32, #tpu.memory_space<vmem>>, %arg6: memref<64x64xf32, #tpu.memory_space<vmem>>) attributes {dimension_semantics = [#tpu.dimension_semantics<parallel>, #tpu.dimension_semantics<parallel>, #tpu.dimension_semantics<arbitrary>], iteration_bounds = array<i64: 1, 1, 1>, scalar_prefetch = 0 : i64, scratch_operands = 1 : i64, tpu.core_type = #tpu.core_type<tc>, window_params = [{transform_indices = @transform_0, window_bounds = array<i64: 64, 32>}, {transform_indices = @transform_1, window_bounds = array<i64: 64, 32>}, {transform_indices = @transform_2, window_bounds = array<i64: 64, 64>}]} {
    %c0_i32 = arith.constant 0 : i32
    %0 = arith.cmpi eq, %arg2, %c0_i32 : i32
    %1 = arith.extui %0 : i1 to i32
    %c0_i32_0 = arith.constant 0 : i32
    %2 = arith.cmpi ne, %1, %c0_i32_0 : i32
    scf.if %2 {
      %cst_10 = arith.constant 0.000000e+00 : f32
      %12 = vector.broadcast %cst_10 : f32 to vector<64x64xf32>
      %c0_11 = arith.constant 0 : index
      %c0_12 = arith.constant 0 : index
      %13 = vector.load %arg6[%c0_11, %c0_12] : memref<64x64xf32, #tpu.memory_space<vmem>>, vector<64x64xf32>
      tpu.vector_store %arg6[%c0_11, %c0_12], %12 {strides = array<i32>} : memref<64x64xf32, #tpu.memory_space<vmem>>, vector<64x64xf32>,
    } else {
    }
    %c0 = arith.constant 0 : index
    %c0_1 = arith.constant 0 : index
    %3 = vector.load %arg6[%c0, %c0_1] : memref<64x64xf32, #tpu.memory_space<vmem>>, vector<64x64xf32>
    %c0_2 = arith.constant 0 : index
    %c0_3 = arith.constant 0 : index
    %4 = vector.load %arg3[%c0_2, %c0_3] : memref<64x32xf32, #tpu.memory_space<vmem>>, vector<64x32xf32>
    %c0_4 = arith.constant 0 : index
    %c0_5 = arith.constant 0 : index
    %5 = vector.load %arg4[%c0_4, %c0_5] : memref<64x32xf32, #tpu.memory_space<vmem>>, vector<64x32xf32>
    %cst = arith.constant dense<0.000000e+00> : vector<64x64xf32>
    %6 = tpu.matmul %4, %5, %cst {dimension_numbers = #tpu.dot_dimension_numbers<[1], [1], [0], [0], [0, 0, 1, 0], [], []>} : vector<64x32xf32>, vector<64x32xf32>, vector<64x64xf32> -> vector<64x64xf32>
    %7 = arith.addf %3, %6 : vector<64x64xf32>
    %c0_6 = arith.constant 0 : index
    %c0_7 = arith.constant 0 : index
    %8 = vector.load %arg6[%c0_6, %c0_7] : memref<64x64xf32, #tpu.memory_space<vmem>>, vector<64x64xf32>
    tpu.vector_store %arg6[%c0_6, %c0_7], %7 {strides = array<i32>} : memref<64x64xf32, #tpu.memory_space<vmem>>, vector<64x64xf32>,
    %c0_i32_8 = arith.constant 0 : i32
    %9 = arith.cmpi eq, %arg2, %c0_i32_8 : i32
    %10 = arith.extui %9 : i1 to i32
    %c0_i32_9 = arith.constant 0 : i32
    %11 = arith.cmpi ne, %10, %c0_i32_9 : i32
    scf.if %11 {
      %c0_10 = arith.constant 0 : index
      %c0_11 = arith.constant 0 : index
      %12 = vector.load %arg6[%c0_10, %c0_11] : memref<64x64xf32, #tpu.memory_space<vmem>>, vector<64x64xf32>
      %c0_12 = arith.constant 0 : index
      %c0_13 = arith.constant 0 : index
      %13 = vector.load %arg5[%c0_12, %c0_13] : memref<64x64xf32, #tpu.memory_space<vmem>>, vector<64x64xf32>
      tpu.vector_store %arg5[%c0_12, %c0_13], %12 {strides = array<i32>} : memref<64x64xf32, #tpu.memory_space<vmem>>, vector<64x64xf32>,
    } else {
    }
    return
  }
  func.func @transform_0(%arg0: i32, %arg1: i32, %arg2: i32) -> (i32, i32) {
    %c0_i32 = arith.constant 0 : i32
    return %arg0, %arg2 : i32, i32
  }
  func.func @transform_1(%arg0: i32, %arg1: i32, %arg2: i32) -> (i32, i32) {
    %c0_i32 = arith.constant 0 : i32
    return %arg1, %arg2 : i32, i32
  }
  func.func @transform_2(%arg0: i32, %arg1: i32, %arg2: i32) -> (i32, i32) {
    %c0_i32 = arith.constant 0 : i32
    return %arg0, %arg1 : i32, i32
  }
}

</mosaic_0001>

<bundles_post_ra>
// kernel: tpu_custom_call.1
= control target key start
LH: loop header
LB: loop body
LE: loop exit
PB: predicated region body
PF: predicated region fallthrough
CT: control target
= control target key end

     0   :  { %vm49_vm0 = vcmask 261120   ;;  %vm16_vm1 = vcmask 523264   ;;  %v375_v6 = vmov 0.0   ;;  %s524_s0 = inlined_call_operand.vmem [shape: f32[64,32], index: 0, kind: input, shape index: {}]   ;;  %s525_s1 = inlined_call_operand.vmem [shape: f32[64,32], index: 1, kind: input, shape index: {}]   ;;  %s526_s2 = inlined_call_operand.hbm [shape: f32[64,64], index: 2, kind: output, shape index: {}]  }
   0x1   :  { %v41_v0 = vld [vmem:[%s525_s1] sm:$0xff]  ;;  %v42_v1 = vld [vmem:[%s525_s1 + $0x8] sm:$0xff]  ;;  %v43_v2 = vld [vmem:[%s525_s1 + $0x10] sm:$0xff]  ;;  %18 = vst.msk [vmem:[#allocation2 + $0x8] sm:$0xff] %vm16_vm1, %v375_v6 }
   0x2   :  { %v315_v3 = vpack.c.bf16 %v42_v1, %v41_v0  ;;  %vm405_vm2 = vmpackc.low %vm49_vm0, %vm49_vm0  ;;  %v44_v5 = vld [vmem:[%s525_s1 + $0x18] sm:$0xff]  ;;  %17 = vst.msk [vmem:[#allocation2] sm:$0xff] %vm16_vm1, %v375_v6  ;;  %v33_v8 = vld [vmem:[%s524_s0] sm:$0xff] }
   0x3   :  { %19 = vst.msk [vmem:[#allocation2 + $0x10] sm:$0xff] %vm16_vm1, %v375_v6  ;;  %20 = vst.msk [vmem:[#allocation2 + $0x18] sm:$0xff] %vm16_vm1, %v375_v6  ;;  %v321_v7 = vpack.c.bf16 %v44_v5, %v43_v2  ;;  %v37_v9 = vld [vmem:[%s524_s0 + $0x20] sm:$0xff] }
   0x4   :  { %21 = vst.msk [vmem:[#allocation2 + $0x20] sm:$0xff] %vm16_vm1, %v375_v6  ;;  %22 = vst.msk [vmem:[#allocation2 + $0x28] sm:$0xff] %vm16_vm1, %v375_v6  ;;  %317 = vmatprep.subr.msk.bf16.mxu0 %vm405_vm2, %v315_v3  ;;  %339 = vmatprep.subr.msk.bf16.mxu1 %vm405_vm2, %v315_v3 }
   0x5   :  { %23 = vst.msk [vmem:[#allocation2 + $0x30] sm:$0xff] %vm16_vm1, %v375_v6  ;;  %24 = vst.msk [vmem:[#allocation2 + $0x38] sm:$0xff] %vm16_vm1, %v375_v6  ;;  %320 = vmatpush3.bf16.xpose.msk.msra.mxu0 %vm405_vm2, %v315_v3  ;;  %343 = vmatpush3.bf16.xpose.msk.msra.mxu1 %vm405_vm2, %v315_v3 }
   0x6   :  { %323 = vmatprep.subr.msk.bf16.mxu0 %vm405_vm2, %v321_v7  ;;  %340 = vmatprep.subr.msk.bf16.mxu1 %vm405_vm2, %v321_v7 }
   0x7   :  { %7 = vsyncpa [#allocation4], 0  ;;  %v45_v10 = vld [vmem:[%s525_s1 + $0x20] sm:$0xff]  ;;  %v46_v11 = vld [vmem:[%s525_s1 + $0x28] sm:$0xff]  ;;  %303 = vmatprep.mubr.msk.f32.mxu0 %vm49_vm0, %v33_v8  ;;  %309 = vmatprep.mubr.msk.f32.mxu1 %vm49_vm0, %v37_v9 }
   0x8   :  { %v327_v12 = vpack.c.bf16 %v46_v11, %v45_v10  ;;  %v47_v13 = vld [vmem:[%s525_s1 + $0x30] sm:$0xff]  ;;  %v48_v14 = vld [vmem:[%s525_s1 + $0x38] sm:$0xff]  ;;  %v34_v16 = vld [vmem:[%s524_s0 + $0x8] sm:$0xff] }
   0x9   :  { %v333_v15 = vpack.c.bf16 %v48_v14, %v47_v13  ;;  %v38_v17 = vld [vmem:[%s524_s0 + $0x28] sm:$0xff]  ;;  %v35_v18 = vld [vmem:[%s524_s0 + $0x10] sm:$0xff]  ;;  %v36_v20 = vld [vmem:[%s524_s0 + $0x18] sm:$0xff] }
   0xa   :  { %v39_v19 = vld [vmem:[%s524_s0 + $0x30] sm:$0xff]  ;;  %v40_v21 = vld [vmem:[%s524_s0 + $0x38] sm:$0xff]  ;;  %v26_v22 = vld [vmem:[#allocation2 + $0x8] sm:$0xff]  ;;  %s376_s0 = smov [#allocation3]  }
   0xb   :  { %v30_v23 = vld [vmem:[#allocation2 + $0x28] sm:$0xff]  ;;  %v25_v24 = vld [vmem:[#allocation2] sm:$0xff]  ;;  %v28_v34 = vld [vmem:[#allocation2 + $0x18] sm:$0xff]  ;;  %s244_s12 = sshll.u32 %s376_s0, 4  ;;  %s245_s12 = int_to_ptr.vmem [resolvable:$true] %s244_s12 }
   0xc   :  { %v29_v25 = vld [vmem:[#allocation2 + $0x20] sm:$0xff]  ;;  %v32_v35 = vld [vmem:[#allocation2 + $0x38] sm:$0xff]  ;;  %v27_v36 = vld [vmem:[#allocation2 + $0x10] sm:$0xff]  ;;  %s351_s13 = scalar_lea.vmem %s245_s12, 1024  ;;  %p356_p1 = scmp.lt.s32.totalorder %s245_s12, %s245_s12 }
   0xd   :  { %326 = vmatpush3.bf16.xpose.msk.msra.mxu0 %vm405_vm2, %v321_v7  ;;  %344 = vmatpush3.bf16.xpose.msk.msra.mxu1 %vm405_vm2, %v321_v7  ;;  %v31_v37 = vld [vmem:[#allocation2 + $0x30] sm:$0xff]  ;;  %p352_p0 = scmp.ne.s32.totalorder %s245_s12, %s351_s13  ;;  %p357_p2 = scmp.lt.s32.totalorder %s351_s13, %s351_s13 }
   0xe   :  { %329 = vmatprep.subr.msk.bf16.mxu0 %vm405_vm2, %v327_v12  ;;  %341 = vmatprep.subr.msk.bf16.mxu1 %vm405_vm2, %v327_v12 }
   0xf   :  { %p358_p3 = por %p357_p2, %p356_p1 }
  0x11   :  { %p359_p4 = pnand %p358_p3, %p352_p0 }
  0x15   :  { %332 = vmatpush3.bf16.xpose.msk.msra.mxu0 %vm405_vm2, %v327_v12  ;;  %345 = vmatpush3.bf16.xpose.msk.msra.mxu1 %vm405_vm2, %v327_v12 }
  0x16   :  { %335 = vmatprep.subr.msk.bf16.mxu0 %vm405_vm2, %v333_v15  ;;  %342 = vmatprep.subr.msk.bf16.mxu1 %vm405_vm2, %v333_v15 }
  0x1d   :  { %338 = vmatpush3.bf16.xpose.msk.msra.mxu0 %vm405_vm2, %v333_v15  ;;  %346 = vmatpush3.bf16.xpose.msk.msra.mxu1 %vm405_vm2, %v333_v15 }
  0x24   :  { %304 = vmatmul.mubr.msk.f32.vlgmr.msra.gmra.mrb[0].mxu0 %vm49_vm0, %v34_v16  ;;  %310 = vmatmul.mubr.msk.f32.vlgmr.msra.gmra.mrb[0].mxu1 %vm49_vm0, %v38_v17 }
  0x25   :  { %306 = vmatprep.mubr.msk.f32.mxu0 %vm49_vm0, %v35_v18  ;;  %312 = vmatprep.mubr.msk.f32.mxu1 %vm49_vm0, %v39_v19 }
  0x28   :  { %307 = vmatmul.mubr.msk.f32.gmra.mrb[2].mxu0 %vm49_vm0, %v36_v20  ;;  %313 = vmatmul.mubr.msk.f32.gmra.mrb[2].mxu1 %vm49_vm0, %v40_v21 }
  0xf7   :  { %v305_v26 = vpop.f32.mrb[0].mxu0  ;;  %v311_v27 = vpop.f32.mrb[0].mxu1 }
  0xf8   :  { %v204_v28 = vadd.f32 %v305_v26, %v26_v22  ;;  %v208_v29 = vadd.f32 %v311_v27, %v30_v23  ;;  %v164_v30 = vpop.f32.mrb[1].mxu0  ;;  %v184_v31 = vpop.f32.mrb[1].mxu1 }
  0xf9   :  { %v203_v32 = vadd.f32 %v164_v30, %v25_v24  ;;  %v207_v33 = vadd.f32 %v184_v31, %v29_v25 }
  0xfa   :  { %213 = vst.msk [vmem:[#allocation2 + $0x8] sm:$0xff] %vm16_vm1, %v204_v28  ;;  %217 = vst.msk [vmem:[#allocation2 + $0x28] sm:$0xff] %vm16_vm1, %v208_v29 }
  0xfb   :  { %212 = vst.msk [vmem:[#allocation2] sm:$0xff] %vm16_vm1, %v203_v32  ;;  %216 = vst.msk [vmem:[#allocation2 + $0x20] sm:$0xff] %vm16_vm1, %v207_v33  ;;  %v308_v38 = vpop.f32.mrb[2].mxu0  ;;  %v314_v39 = vpop.f32.mrb[2].mxu1 }
  0xfc   :  { %v206_v40 = vadd.f32 %v308_v38, %v28_v34  ;;  %v210_v41 = vadd.f32 %v314_v39, %v32_v35  ;;  %v174_v42 = vpop.f32.mrb[3].mxu0  ;;  %v194_v43 = vpop.f32.mrb[3].mxu1 }
  0xfd   :  { %v205_v44 = vadd.f32 %v174_v42, %v27_v36  ;;  %v209_v45 = vadd.f32 %v194_v43, %v31_v37 }
  0xfe   :  { %215 = vst.msk [vmem:[#allocation2 + $0x18] sm:$0xff] %vm16_vm1, %v206_v40  ;;  %219 = vst.msk [vmem:[#allocation2 + $0x38] sm:$0xff] %vm16_vm1, %v210_v41 }
  0xff   :  { %214 = vst.msk [vmem:[#allocation2 + $0x10] sm:$0xff] %vm16_vm1, %v205_v44  ;;  %218 = vst.msk [vmem:[#allocation2 + $0x30] sm:$0xff] %vm16_vm1, %v209_v45 }
 0x101   :  { %v224_v46 = vld [vmem:[#allocation2 + $0x8] sm:$0xff] }
 0x102   :  { %v228_v47 = vld [vmem:[#allocation2 + $0x28] sm:$0xff]  ;;  %v223_v48 = vld [vmem:[#allocation2] sm:$0xff]  ;;  %232 = vst.msk [vmem:[#allocation3 + $0x8] sm:$0xff] %vm16_vm1, %v224_v46 }
 0x103   :  { %v227_v49 = vld [vmem:[#allocation2 + $0x20] sm:$0xff]  ;;  %236 = vst.msk [vmem:[#allocation3 + $0x28] sm:$0xff] %vm16_vm1, %v228_v47  ;;  %231 = vst.msk [vmem:[#allocation3] sm:$0xff] %vm16_vm1, %v223_v48 }
 0x104   :  { %235 = vst.msk [vmem:[#allocation3 + $0x20] sm:$0xff] %vm16_vm1, %v227_v49 }
 0x105   :  { %v226_v50 = vld [vmem:[#allocation2 + $0x18] sm:$0xff] }
 0x106   :  { %v230_v51 = vld [vmem:[#allocation2 + $0x38] sm:$0xff]  ;;  %v225_v52 = vld [vmem:[#allocation2 + $0x10] sm:$0xff]  ;;  %234 = vst.msk [vmem:[#allocation3 + $0x18] sm:$0xff] %vm16_vm1, %v226_v50 }
 0x107   :  { %v229_v53 = vld [vmem:[#allocation2 + $0x30] sm:$0xff]  ;;  %238 = vst.msk [vmem:[#allocation3 + $0x38] sm:$0xff] %vm16_vm1, %v230_v51  ;;  %233 = vst.msk [vmem:[#allocation3 + $0x10] sm:$0xff] %vm16_vm1, %v225_v52 }
 0x108   :  { %237 = vst.msk [vmem:[#allocation3 + $0x30] sm:$0xff] %vm16_vm1, %v229_v53 }
 0x109   :  { %362 = shalt.err (!%p359_p4)
}
 0x10a   :  { %s363_s16 = scalar_lea.hbm %s526_s2, 1024 }
 0x10b   :  { %p364_p5 = scmp.ne.s32.totalorder %s526_s2, %s363_s16  ;;  %p367_p6 = scmp.lt.u32.totalorder %s363_s16, %s526_s2 }
 0x10d   :  { %p369_p7 = pnand %p367_p6, %p364_p5 }
 0x10f   :  { %372 = shalt.err (!%p369_p7)
}
 0x110   :  { %s377_s21 = smov 128   ;;  %s378_s22 = smov 8  }
 0x111   :  { %250 = dma.vmem_to_hbm [thread:$0]  %s245_s12, 1024, %s526_s2, [#allocation4], %s377_s21, %s377_s21, %s378_s22  }
 0x112   :  { %373 = dma.done.wait [#allocation4], 1024  }
 0x113   :  { %374 = vsyncadd [#allocation4], 4294966272 }
 0x114   :  { %254 = vsyncpa [#allocation4], 1 }

</bundles_post_ra>
